<compile_context>
chip_gen: v6e
topology: v6e:2x2x1
jax: 0.10.0
libtpu: 0.0.40
codegen_flags: <defaults>
</compile_context>

<pallas_src>
import functools

import numpy as np
import jax
import jax.numpy as jnp
from jax.experimental import pallas as pl
from jax.experimental.pallas import tpu as pltpu


# ----------------------------------------------------------------------------
# Kernel 1: strict-local-maxima peak mask (tensor part of signal.find_peaks).
# ----------------------------------------------------------------------------
def _peak_kernel(x_ref, mask_ref, *, t_valid):
    x = x_ref[...]                                     # (BLK_B, T_pad)
    t_pad = x.shape[-1]

    # Neighbors via XLU lane rotations (free-ish: XLU slot, not VALU).
    left = pltpu.roll(x, shift=1, axis=1)              # x[t-1]
    right = pltpu.roll(x, shift=t_pad - 1, axis=1)     # x[t+1]

    # Endpoints of the valid range and every padded column can never be peaks
    # (find_peaks requires both neighbors to exist), so zero padding is safe.
    idx = jax.lax.broadcasted_iota(jnp.int32, x.shape, 1)
    interior = (idx >= 1) & (idx <= t_valid - 2)

    # TODO(synk): scipy.signal.find_peaks plateau (flat-top) handling is not
    # implemented; strict local maxima only.
    is_peak = (x > left) & (x > right) & interior
    mask_ref[...] = is_peak.astype(jnp.int8)           # lane-dense int8 store


def _choose_blk_b(batch, t_pad, in_bytes):
    """Rows per block: multiple of 32 (int8 sublane tile), ~4 MiB of input per
    block, double-buffered in+out footprint kept under ~12 MiB so it fits the
    default scoped VMEM on v5e (16 MiB) as well as v6e/v7x (32 MiB)."""
    target = max(1, (4 << 20) // (in_bytes * t_pad))
    cap = max(1, (12 << 20) // (2 * (in_bytes + 1) * t_pad))
    blk = max(32, (min(target, cap) // 32) * 32)
    b32 = pl.cdiv(batch, 32) * 32
    return min(blk, b32)


@jax.jit
def peak_mask_padded(bvp_2d):
    """(B, T) float -> (B_pad, T_pad) int8 strict-local-maxima mask.

    Padded rows/cols are guaranteed zero; callers index only [:B, :T]."""
    x = bvp_2d
    if x.dtype not in (jnp.float32, jnp.bfloat16):
        x = x.astype(jnp.float32)
    B, T = x.shape
    in_bytes = jnp.dtype(x.dtype).itemsize

    T_pad = pl.cdiv(T, 128) * 128
    BLK_B = _choose_blk_b(B, T_pad, in_bytes)
    B_pad = pl.cdiv(B, BLK_B) * BLK_B

    # Single zero pad (fused into this one jitted dispatch); zeros can never
    # be peaks and padded columns are excluded by the interior mask anyway.
    xp = jnp.pad(x, ((0, B_pad - B), (0, T_pad - T)))

    return pl.pallas_call(
        functools.partial(_peak_kernel, t_valid=T),
        out_shape=jax.ShapeDtypeStruct((B_pad, T_pad), jnp.int8),
        grid=(B_pad // BLK_B,),
        in_specs=[pl.BlockSpec((BLK_B, T_pad), lambda i: (i, 0))],
        out_specs=pl.BlockSpec((BLK_B, T_pad), lambda i: (i, 0)),
        compiler_params=pltpu.CompilerParams(
            dimension_semantics=("parallel",)),          # megacore / v7x 2-TC
    )(xp)


# ----------------------------------------------------------------------------
# Kernel 2: thresholded L1 loss, stacked input, SMEM scalar output.
#   temp = |rrs - pre_rr|; loss = mean(|where(temp >= thr, pre_rr, rrs) - rrs|)
# Zero padding contributes |0 - 0| = 0 to the sum; divide by the true count.
# ----------------------------------------------------------------------------
def _loss_kernel(x_ref, o_ref, *, thr, inv_n):
    x = x_ref[...]                                      # (2, B_pad) f32, VMEM
    rrs = x[0:1, :]
    pre = x[1:2, :]
    temp = jnp.abs(rrs - pre)
    sel = jnp.where(temp >= thr, pre, rrs)
    o_ref[0] = jnp.sum(jnp.abs(sel - rrs)) * inv_n      # scalar -> SMEM


@functools.partial(jax.jit, static_argnames=("thr",))
def rr_loss(rrs, pre_rr, thr=5.0):
    B = rrs.shape[0]
    B_pad = pl.cdiv(B, 128) * 128                       # full 128-lane rows
    x = jnp.stack([rrs.astype(jnp.float32),
                   pre_rr.astype(jnp.float32)])         # (2, B)
    x = jnp.pad(x, ((0, 0), (0, B_pad - B)))            # single zero pad

    out = pl.pallas_call(
        functools.partial(_loss_kernel, thr=float(thr), inv_n=1.0 / float(B)),
        out_shape=jax.ShapeDtypeStruct((1,), jnp.float32),
        in_specs=[pl.BlockSpec(memory_space=pltpu.MemorySpace.VMEM)],
        out_specs=pl.BlockSpec(memory_space=pltpu.MemorySpace.SMEM),
    )(x)
    return out[0]


# ----------------------------------------------------------------------------
# Host-side glue mirroring scipy.signal.welch defaults (fs=1, periodic hann,
# nperseg=min(256, n), 50% overlap, constant detrend, one-sided density).
# TODO(synk): peak-index extraction + diff + Welch operate on data-dependent,
# variable-length arrays per batch element; no static-shape Pallas equivalent,
# kept (serially) in NumPy.
# ----------------------------------------------------------------------------
def _welch_psd(x):
    x = np.asarray(x, dtype=np.float64)
    n = x.size
    nperseg = min(256, n)
    noverlap = nperseg // 2
    step = nperseg - noverlap
    fs = 1.0
    k = np.arange(nperseg)
    win = 0.5 - 0.5 * np.cos(2.0 * np.pi * k / nperseg)   # periodic hann
    scale = 1.0 / (fs * np.sum(win * win))
    freqs = np.arange(nperseg // 2 + 1) * (fs / nperseg)
    specs = []
    for start in range(0, n - nperseg + 1, step):
        seg = x[start:start + nperseg]
        seg = seg - seg.mean()                             # detrend='constant'
        spec = np.fft.rfft(seg * win)
        p = (np.abs(spec) ** 2) * scale
        if nperseg % 2 == 0:
            p[1:-1] *= 2.0
        else:
            p[1:] *= 2.0
        specs.append(p)
    psd = np.mean(specs, axis=0)
    return freqs, psd


def bvp_rr_loss_forward(gt_bvp, pre_rr, thr=5.0):
    if gt_bvp.ndim < 3:
        return jnp.array(0, dtype=jnp.int32)               # torch.tensor(0)
    B = gt_bvp.shape[0]
    bvp2d = jnp.squeeze(gt_bvp, axis=1)                    # (B, T)

    # One jitted dispatch + one D2H transfer of the 1-byte/element mask.
    # Padded rows are never visited; padded columns are guaranteed zero.
    mask = np.asarray(peak_mask_padded(bvp2d))

    rrs = np.zeros(B, dtype=np.float32)
    for i in range(B):
        peaks = np.where(mask[i] != 0)[0]
        rr_intervals = np.diff(peaks) / 30.0
        if rr_intervals.size < 2:                          # degenerate trace guard
            # TODO(synk): reference would NaN/error here; we return 0 instead.
            rrs[i] = 0.0
            continue
        freqs, psd = _welch_psd(rr_intervals)
        band = (freqs >= 0.12) & (freqs <= 0.4)
        if band.sum() == 0:
            rrs[i] = 0.0
            continue
        f = freqs[band][np.argmax(psd[band])]
        rrs[i] = 60.0 * f

    return rr_loss(jnp.asarray(rrs, dtype=jnp.float32), pre_rr, thr=float(thr))


if __name__ == "__main__":
    B, T = 4, 300                                          # ~10 s at 30 fps
    key = jax.random.PRNGKey(0)
    k1, k2 = jax.random.split(key)

    t = jnp.arange(T, dtype=jnp.float32)
    hr_hz = jnp.array([1.0, 1.2, 1.4, 1.6], dtype=jnp.float32)[:, None]
    bvp = jnp.sin(2.0 * jnp.pi * hr_hz * t / 30.0)
    bvp = bvp + 0.05 * jax.random.normal(k1, (B, T), dtype=jnp.float32)
    gt_bvp = bvp[:, None, :].astype(jnp.float32)           # (B, 1, T)

    pre_rr = jax.random.uniform(k2, (B,), minval=5.0, maxval=30.0,
                                dtype=jnp.float32)

    loss = bvp_rr_loss_forward(gt_bvp, pre_rr, thr=5.0)
    jax.block_until_ready(loss)
    print("KERNEL_OK")
</pallas_src>

<mosaic_0001>
module attributes {stable_mosaic.version = 11 : i64} {
  func.func @_peak_kernel(%arg0: i32, %arg1: memref<32x384xf32, #tpu.memory_space<vmem>>, %arg2: memref<32x384xi8, #tpu.memory_space<vmem>>) attributes {dimension_semantics = [#tpu.dimension_semantics<parallel>], iteration_bounds = array<i64: 1>, scalar_prefetch = 0 : i64, scratch_operands = 0 : i64, tpu.core_type = #tpu.core_type<tc>, window_params = [{transform_indices = @transform_0, window_bounds = array<i64: 32, 384>}, {transform_indices = @transform_1, window_bounds = array<i64: 32, 384>}]} {
    %c0 = arith.constant 0 : index
    %c0_0 = arith.constant 0 : index
    %0 = vector.load %arg1[%c0, %c0_0] : memref<32x384xf32, #tpu.memory_space<vmem>>, vector<32x384xf32>
    %c1_i32 = arith.constant 1 : i32
    %1 = tpu.dynamic_rotate %0 by %c1_i32 dim 1 : vector<32x384xf32>, i32 -> vector<32x384xf32>
    %c383_i32 = arith.constant 383 : i32
    %2 = tpu.dynamic_rotate %0 by %c383_i32 dim 1 : vector<32x384xf32>, i32 -> vector<32x384xf32>
    %3 = tpu.iota {dimensions = array<i32: 1>} : vector<32x384xi32>
    %c1_i32_1 = arith.constant 1 : i32
    %4 = vector.broadcast %c1_i32_1 : i32 to vector<32x384xi32>
    %5 = arith.cmpi sge, %3, %4 : vector<32x384xi32>
    %c298_i32 = arith.constant 298 : i32
    %6 = vector.broadcast %c298_i32 : i32 to vector<32x384xi32>
    %7 = arith.cmpi sle, %3, %6 : vector<32x384xi32>
    %8 = arith.andi %5, %7 : vector<32x384xi1>
    %9 = arith.cmpf ogt, %0, %1 : vector<32x384xf32>
    %10 = arith.cmpf ogt, %0, %2 : vector<32x384xf32>
    %11 = arith.andi %9, %10 : vector<32x384xi1>
    %12 = arith.andi %11, %8 : vector<32x384xi1>
    %13 = arith.extui %12 : vector<32x384xi1> to vector<32x384xi8>
    %c0_2 = arith.constant 0 : index
    %c0_3 = arith.constant 0 : index
    %14 = vector.load %arg2[%c0_2, %c0_3] : memref<32x384xi8, #tpu.memory_space<vmem>>, vector<32x384xi8>
    tpu.vector_store %arg2[%c0_2, %c0_3], %13 {strides = array<i32>} : memref<32x384xi8, #tpu.memory_space<vmem>>, vector<32x384xi8>,
    return
  }
  func.func @transform_0(%arg0: i32) -> (i32, i32) {
    %c0_i32 = arith.constant 0 : i32
    %c0_i32_0 = arith.constant 0 : i32
    return %arg0, %c0_i32 : i32, i32
  }
  func.func @transform_1(%arg0: i32) -> (i32, i32) {
    %c0_i32 = arith.constant 0 : i32
    %c0_i32_0 = arith.constant 0 : i32
    return %arg0, %c0_i32 : i32, i32
  }
}

</mosaic_0001>

<bundles_post_ra>
// kernel: peak_mask_padded.1
= control target key start
LH: loop header
LB: loop body
LE: loop exit
PB: predicated region body
PF: predicated region fallthrough
CT: control target
= control target key end

     0   :  { %s213_s10 = smov 1   ;;  %s501_s0 = inlined_call_operand.vmem [shape: f32[32,384], index: 0, kind: input, shape index: {}]   ;;  %s502_s1 = inlined_call_operand.hbm [shape: s8[32,384], index: 1, kind: output, shape index: {}]  }
   0x1   :  { %v230_v0 = vld [vmem:[%s501_s0 + $0x30] sm:$0xff]  ;;  %v235_v1 = vld [vmem:[%s501_s0] sm:$0xff]  ;;  %v242_v2 = vld [vmem:[%s501_s0 + $0x48] sm:$0xff] }
   0x2   :  { %27 = vrot.lane.b32.xlu1 %v230_v0, %s213_s10  ;;  %23 = vrot.lane.b32.xlu0 %v235_v1, %s213_s10  ;;  %v247_v3 = vld [vmem:[%s501_s0 + $0x18] sm:$0xff] }
   0x3   :  { %6 = vsyncpa [#allocation3], 0  ;;  %v254_v4 = vld [vmem:[%s501_s0 + $0x20] sm:$0xff]  ;;  %v259_v5 = vld [vmem:[%s501_s0 + $0x8] sm:$0xff]  ;;  %s214_s2 = smov 127   ;;  %v47_v24 = vlaneseq  ;;  %v513_v57 = vmov 0 }
   0x4   :  { %v266_v6 = vld [vmem:[%s501_s0 + $0x50] sm:$0xff]  ;;  %v271_v7 = vld [vmem:[%s501_s0 + $0x38] sm:$0xff]  ;;  %v278_v8 = vld [vmem:[%s501_s0 + $0x28] sm:$0xff]  ;;  %v215_v58 = vmov 0   ;;  %v515_v60 = vmov 0  ;;  %v517_v63 = vmov 0 }
   0x5   :  { %v283_v9 = vld [vmem:[%s501_s0 + $0x10] sm:$0xff]  ;;  %v290_v10 = vld [vmem:[%s501_s0 + $0x58] sm:$0xff]  ;;  %v295_v11 = vld [vmem:[%s501_s0 + $0x40] sm:$0xff]  ;;  %v327_v27 = vand.u32 127, %v47_v24  ;;  %s216_s0 = smov [#allocation2]  }
   0x6   :  { %29 = vrot.lane.b32.xlu1 %v242_v2, %s213_s10  ;;  %25 = vrot.lane.b32.xlu0 %v247_v3, %s213_s10  ;;  %s179_s3 = sshll.u32 %s216_s0, 4  ;;  %s180_s3 = int_to_ptr.vmem [resolvable:$true] %s179_s3 }
   0x7   :  { %vm49_vm0 = vcmp.lt.s32.totalorder %v327_v27, 1  ;;  %vm86_vm1 = vcmp.lt.s32.totalorder %v327_v27, 127  ;;  %vm101_vm2 = vcmp.ge.s32.totalorder %v327_v27, 1  ;;  %v100_v47 = vadd.s32 256, %v327_v27  ;;  %s191_s4 = scalar_lea.vmem %s180_s3, 384  ;;  %p196_p1 = scmp.lt.s32.totalorder %s180_s3, %s180_s3 }
   0x8   :  { %p192_p0 = scmp.ne.s32.totalorder %s180_s3, %s191_s4  ;;  %p197_p2 = scmp.lt.s32.totalorder %s191_s4, %s191_s4 }
   0xa   :  { %33 = vrot.lane.b32.xlu1 %v254_v4, %s213_s10  ;;  %31 = vrot.lane.b32.xlu0 %v259_v5, %s213_s10  ;;  %p198_p3 = por %p197_p2, %p196_p1 }
   0xc   :  { %p199_p4 = pnand %p198_p3, %p192_p0 }
   0xe   :  { %37 = vrot.lane.b32.xlu1 %v266_v6, %s213_s10  ;;  %35 = vrot.lane.b32.xlu0 %v271_v7, %s213_s10 }
  0x12   :  { %41 = vrot.lane.b32.xlu1 %v278_v8, %s213_s10  ;;  %39 = vrot.lane.b32.xlu0 %v283_v9, %s213_s10 }
  0x16   :  { %45 = vrot.lane.b32.xlu1 %v290_v10, %s213_s10  ;;  %43 = vrot.lane.b32.xlu0 %v295_v11, %s213_s10 }
  0x1a   :  { %64 = vrot.lane.b32.xlu1 %v247_v3, %s214_s2  ;;  %62 = vrot.lane.b32.xlu0 %v235_v1, %s214_s2 }
  0x1e   :  { %68 = vrot.lane.b32.xlu1 %v242_v2, %s214_s2  ;;  %66 = vrot.lane.b32.xlu0 %v230_v0, %s214_s2 }
  0x22   :  { %72 = vrot.lane.b32.xlu1 %v254_v4, %s214_s2  ;;  %70 = vrot.lane.b32.xlu0 %v259_v5, %s214_s2 }
  0x26   :  { %76 = vrot.lane.b32.xlu1 %v266_v6, %s214_s2  ;;  %74 = vrot.lane.b32.xlu0 %v271_v7, %s214_s2 }
  0x2a   :  { %80 = vrot.lane.b32.xlu1 %v278_v8, %s214_s2  ;;  %78 = vrot.lane.b32.xlu0 %v283_v9, %s214_s2 }
  0x2e   :  { %84 = vrot.lane.b32.xlu1 %v290_v10, %s214_s2  ;;  %82 = vrot.lane.b32.xlu0 %v295_v11, %s214_s2 }
  0x74   :  { %v311_v12 = vpop.permute.xlu1 %27  ;;  %v313_v13 = vpop.permute.xlu0 %23 }
  0x78   :  { %v315_v14 = vpop.permute.xlu1 %29  ;;  %v26_v15 = vpop.permute.xlu0 %25 }
  0x7c   :  { %v34_v16 = vpop.permute.xlu1 %33  ;;  %v317_v17 = vpop.permute.xlu0 %31 }
  0x7d   :  { %v55_v50 = vsel %vm49_vm0, %v26_v15, %v34_v16  ;;  %v54_v54 = vsel %vm49_vm0, %v313_v13, %v317_v17 }
  0x80   :  { %v319_v18 = vpop.permute.xlu1 %37  ;;  %v321_v19 = vpop.permute.xlu0 %35 }
  0x84   :  { %v42_v20 = vpop.permute.xlu1 %41  ;;  %v40_v21 = vpop.permute.xlu0 %39 }
  0x85   :  { %v59_v30 = vsel %vm49_vm0, %v42_v20, %v26_v15  ;;  %v58_v33 = vsel %vm49_vm0, %v40_v21, %v313_v13  ;;  %v51_v51 = vsel %vm49_vm0, %v34_v16, %v42_v20  ;;  %v50_v56 = vsel %vm49_vm0, %v317_v17, %v40_v21 }
  0x86   :  { %vm113_vm3 = vcmp.gt.f32.partialorder %v247_v3, %v59_v30  ;;  %vm110_vm7 = vcmp.gt.f32.partialorder %v235_v1, %v58_v33 }
  0x88   :  { %v323_v22 = vpop.permute.xlu1 %45  ;;  %v325_v23 = vpop.permute.xlu0 %43 }
  0x89   :  { %v61_v36 = vsel %vm49_vm0, %v323_v22, %v315_v14  ;;  %v60_v42 = vsel %vm49_vm0, %v325_v23, %v311_v12 }
  0x8a   :  { %vm119_vm12 = vcmp.gt.f32.partialorder %v242_v2, %v61_v36 }
  0x8c   :  { %v65_v25 = vpop.permute.xlu1 %64  ;;  %v63_v26 = vpop.permute.xlu0 %62 }
  0x90   :  { %v329_v28 = vpop.permute.xlu1 %68  ;;  %v331_v29 = vpop.permute.xlu0 %66 }
  0x94   :  { %v73_v31 = vpop.permute.xlu1 %72  ;;  %v71_v32 = vpop.permute.xlu0 %70 }
  0x95   :  { %v92_v34 = vsel %vm86_vm1, %v65_v25, %v73_v31  ;;  %v91_v35 = vsel %vm86_vm1, %v63_v26, %v71_v32 }
  0x96   :  { %vm125_vm4 = vcmp.gt.f32.partialorder %v247_v3, %v92_v34  ;;  %vm122_vm5 = vcmp.gt.f32.partialorder %v235_v1, %v91_v35  ;;  %v57_v1 = vsel %vm49_vm0, %v315_v14, %v319_v18  ;;  %v519_v3 = vmov 0 }
  0x97   :  { %vm137_vm6 = vmand %vm113_vm3, %vm125_vm4  ;;  %vm116_vm3 = vcmp.gt.f32.partialorder %v230_v0, %v60_v42 }
  0x98   :  { %vm355_vm8 = vmand %vm137_vm6, %vm101_vm2  ;;  %v77_v38 = vpop.permute.xlu1 %76  ;;  %v75_v39 = vpop.permute.xlu0 %74 }
  0x99   :  { %vm134_vm9 = vmand %vm110_vm7, %vm122_vm5  ;;  %v94_v40 = vsel %vm86_vm1, %v329_v28, %v77_v38  ;;  %v93_v41 = vsel %vm86_vm1, %v331_v29, %v75_v39 }
  0x9a   :  { %vm371_vm10 = vmand %vm134_vm9, %vm101_vm2  ;;  %vm131_vm11 = vcmp.gt.f32.partialorder %v242_v2, %v94_v40  ;;  %vm128_vm14 = vcmp.gt.f32.partialorder %v230_v0, %v93_v41  ;;  %v53_v2 = vsel %vm49_vm0, %v319_v18, %v323_v22 }
  0x9b   :  { %vm158_vm13 = vmpackc.low %vm355_vm8, %vm371_vm10  ;;  %vm111_vm8 = vcmp.gt.f32.partialorder %v259_v5, %v54_v54 }
  0x9c   :  { %vm143_vm15 = vmand %vm119_vm12, %vm131_vm11  ;;  %v81_v44 = vpop.permute.xlu1 %80  ;;  %v79_v45 = vpop.permute.xlu0 %78  ;;  %vm114_vm12 = vcmp.gt.f32.partialorder %v254_v4, %v55_v50 }
  0x9d   :  { %vm385_vm4 = vmand %vm143_vm15, %vm101_vm2  ;;  %v88_v48 = vsel %vm86_vm1, %v73_v31, %v81_v44  ;;  %v96_v49 = vsel %vm86_vm1, %v81_v44, %v65_v25  ;;  %v87_v52 = vsel %vm86_vm1, %v71_v32, %v79_v45  ;;  %v95_v53 = vsel %vm86_vm1, %v79_v45, %v63_v26 }
  0x9e   :  { %vm140_vm5 = vmand %vm116_vm3, %vm128_vm14  ;;  %vm126_vm7 = vcmp.gt.f32.partialorder %v254_v4, %v88_v48  ;;  %vm127_vm11 = vcmp.gt.f32.partialorder %v278_v8, %v96_v49  ;;  %vm106_vm14 = vcmp.le.s32.totalorder %v100_v47, 298  ;;  %vm115_vm15 = vcmp.gt.f32.partialorder %v278_v8, %v51_v51 }
  0x9f   :  { %vm152_vm6 = vmand %vm140_vm5, %vm101_vm2  ;;  %v56_v8 = vsel %vm49_vm0, %v311_v12, %v321_v19 }
  0xa0   :  { %vm159_vm9 = vmpackc.low %vm385_vm4, %vm152_vm6  ;;  %v85_v55 = vpop.permute.xlu1 %84  ;;  %vm123_vm4 = vcmp.gt.f32.partialorder %v259_v5, %v87_v52  ;;  %vm124_vm6 = vcmp.gt.f32.partialorder %v283_v9, %v95_v53  ;;  %v83_v62 = vpop.permute.xlu0 %82 }
  0xa1   :  { %vm160_vm2 = vmpackc.even %vm159_vm9, %vm158_vm13  ;;  %v90_v61 = vsel %vm86_vm1, %v77_v38, %v85_v55  ;;  %vm112_vm13 = vcmp.gt.f32.partialorder %v283_v9, %v50_v56  ;;  %v98_v0 = vsel %vm86_vm1, %v85_v55, %v329_v28  ;;  %v89_v4 = vsel %vm86_vm1, %v75_v39, %v83_v62 }
  0xa2   :  { %vm422_vm3 = vmand %vm114_vm12, %vm126_vm7  ;;  %v167_v59 = vsel %vm160_vm2, 16843009, %v215_v58  ;;  %vm132_vm12 = vcmp.gt.f32.partialorder %v266_v6, %v90_v61  ;;  %vm133_vm2 = vcmp.gt.f32.partialorder %v290_v10, %v98_v0  ;;  %v97_v5 = vsel %vm86_vm1, %v83_v62, %v331_v29 }
  0xa3   :  { %v514_v57 = vsel %vm422_vm3, 4294967295, %v513_v57  ;;  %vm139_vm5 = vmand %vm115_vm15, %vm127_vm11  ;;  %170 = vst [vmem:[#allocation2] sm:$0xff] %v167_v59  ;;  %vm120_vm15 = vcmp.gt.f32.partialorder %v266_v6, %v57_v1  ;;  %v52_v9 = vsel %vm49_vm0, %v321_v19, %v325_v23 }
  0xa4   :  { %vm430_vm10 = vmand %vm139_vm5, %vm106_vm14  ;;  %vm121_vm5 = vcmp.gt.f32.partialorder %v290_v10, %v53_v2  ;;  %vm118_vm3 = vcmp.gt.f32.partialorder %v295_v11, %v52_v9 }
  0xa5   :  { %v516_v60 = vsel %vm430_vm10, 4294967295, %v515_v60  ;;  %vm437_vm7 = vmand %vm111_vm8, %vm123_vm4  ;;  %vm129_vm8 = vcmp.gt.f32.partialorder %v271_v7, %v89_v4  ;;  %vm117_vm4 = vcmp.gt.f32.partialorder %v271_v7, %v56_v8 }
  0xa6   :  { %v518_v63 = vsel %vm437_vm7, 4294967295, %v517_v63  ;;  %vm136_vm9 = vmand %vm112_vm13, %vm124_vm6 }
  0xa7   :  { %vm453_vm11 = vmand %vm136_vm9, %vm106_vm14  ;;  %vm130_vm9 = vcmp.gt.f32.partialorder %v295_v11, %v97_v5 }
  0xa8   :  { %v520_v3 = vsel %vm453_vm11, 4294967295, %v519_v3  ;;  %vm144_vm6 = vmand %vm120_vm15, %vm132_vm12  ;;  %vm521_vm12 = vnez %v514_v57  ;;  %vm522_vm15 = vnez %v518_v63 }
  0xa9   :  { %vm145_vm13 = vmand %vm121_vm5, %vm133_vm2 }
  0xaa   :  { %vm157_vm7 = vmand %vm145_vm13, %vm106_vm14 }
  0xab   :  { %vm141_vm0 = vmand %vm117_vm4, %vm129_vm8  ;;  %vm524_vm4 = vnez %v516_v60  ;;  %vm525_vm8 = vnez %v520_v3 }
  0xac   :  { %vm142_vm1 = vmand %vm118_vm3, %vm130_vm9 }
  0xad   :  { %vm154_vm10 = vmand %vm142_vm1, %vm106_vm14 }
  0xae   :  { %vm162_vm11 = vmpackc.low %vm144_vm6, %vm141_vm0 }
  0xaf   :  { %vm523_vm2 = vmpackc.low %vm521_vm12, %vm522_vm15 }
  0xb0   :  { %vm163_vm5 = vmpackc.even %vm162_vm11, %vm523_vm2 }
  0xb1   :  { %vm165_vm13 = vmpackc.low %vm157_vm7, %vm154_vm10  ;;  %v168_v6 = vsel %vm163_vm5, 16843009, %v215_v58 }
  0xb2   :  { %vm526_vm3 = vmpackc.low %vm524_vm4, %vm525_vm8  ;;  %171 = vst [vmem:[#allocation2 + $0x8] sm:$0xff] %v168_v6 }
  0xb3   :  { %vm166_vm9 = vmpackc.even %vm165_vm13, %vm526_vm3 }
  0xb4   :  { %v169_v7 = vsel %vm166_vm9, 16843009, %v215_v58 }
  0xb5   :  { %172 = vst [vmem:[#allocation2 + $0x10] sm:$0xff] %v169_v7 }
  0xb6   :  { %202 = shalt.err (!%p199_p4)
}
  0xb7   :  { %182 = dma.vmem_to_hbm [thread:$0]  %s180_s3, 384, %s502_s1, [#allocation3]  }
  0xb8   :  { %211 = dma.done.wait [#allocation3], 384  }
  0xb9   :  { %212 = vsyncadd [#allocation3], 4294966912 }
  0xba   :  { %186 = vsyncpa [#allocation3], 1 }

</bundles_post_ra>
